<compile_context>
chip_gen: v7x
topology: tpu7x:2x2x1
jax: 0.10.0
libtpu: 0.0.40
codegen_flags: <defaults>
</compile_context>

<pallas_src>
import jax
import jax.numpy as jnp
from jax.experimental import pallas as pl
from jax.experimental.pallas import tpu as pltpu


def _round_up(x, m):
    return ((x + m - 1) // m) * m


def _ensemble_kernel(ner_ref, orig_ref, w1a_ref, w1b_ref, b1_ref, w2d_ref,
                     b2d_ref, out_ref):
    # ner_ref/orig_ref: (TB, D)  activation tiles (bf16 or f32)
    # w1a_ref/w1b_ref:  (D, Hp)  resident first-layer weight halves
    # b1_ref:           (1, Hp)  f32
    # w2d_ref:          (Hp, 1)  f32 logit-difference weights
    # b2d_ref:          (1, 1)   f32 scalar in SMEM
    # out_ref:          (TB, 1)  f32 = sigmoid(logit1 - logit0)

    # Fused concat: cat([a, b]) @ W1 == a @ W1[:D] + b @ W1[D:]
    h = (jnp.dot(ner_ref[...], w1a_ref[...], preferred_element_type=jnp.float32)
         + jnp.dot(orig_ref[...], w1b_ref[...], preferred_element_type=jnp.float32)
         + b1_ref[...])
    h = jnp.maximum(h, 0.0)

    # softmax([l0, l1]) == [1 - sigmoid(z), sigmoid(z)] with z = l1 - l0.
    z = jnp.dot(h, w2d_ref[...], preferred_element_type=jnp.float32) + b2d_ref[0, 0]
    out_ref[...] = (0.5 * (jnp.tanh(0.5 * z) + 1.0)).astype(out_ref.dtype)


def _choose_tile(batch, tile_b):
    tb = min(tile_b, _round_up(batch, 8))
    # For mid-size batches keep >= ~8 grid steps (feeds both v7x TCs) while
    # never dropping below 512 rows per tile (DMA efficiency).
    if batch >= 1024:
        tb = min(tb, max(512, _round_up(pl.cdiv(batch, 8), 8)))
    return max(8, (tb // 8) * 8)


def simple_ensemble_weights(ner_emb, original_emb, params, *,
                            tile_b=2048, activation_dtype=jnp.bfloat16):
    """Pallas implementation of SimpleEnsembleWeights.forward."""
    w1, b1, w2, b2 = params["w1"], params["b1"], params["w2"], params["b2"]
    B, D = ner_emb.shape
    hidden = w1.shape[1]
    Hp = _round_up(hidden, 128)            # lane-dense hidden (zero padding is exact)

    # --- wrapper-side weight prep (tiny, done once per call) -----------------
    w1a = jnp.pad(w1[:D], ((0, 0), (0, Hp - hidden))).astype(activation_dtype)   # (D, Hp)
    w1b = jnp.pad(w1[D:], ((0, 0), (0, Hp - hidden))).astype(activation_dtype)   # (D, Hp)
    b1p = jnp.pad(b1.reshape(1, hidden), ((0, 0), (0, Hp - hidden))).astype(jnp.float32)  # (1, Hp)
    b2r = b2.reshape(1, -1)
    w2d = jnp.pad(w2[:, 1:2] - w2[:, 0:1],
                  ((0, Hp - hidden), (0, 0))).astype(jnp.float32)                 # (Hp, 1)
    b2d = (b2r[:, 1:2] - b2r[:, 0:1]).astype(jnp.float32)                         # (1, 1) -> SMEM

    ner = ner_emb.astype(activation_dtype)
    orig = original_emb.astype(activation_dtype)

    # --- tiling (no jnp.pad: Pallas clamps the edge block) -------------------
    tb = _choose_tile(B, tile_b)
    grid = (pl.cdiv(B, tb),)

    act_bytes = jnp.dtype(activation_dtype).itemsize
    vmem_need = (2 * 2 * tb * D * act_bytes                    # 2 act inputs x 2 buffers
                 + 2 * (2 * D * Hp * act_bytes + 2 * Hp * 4)   # resident weights (x2 bufs)
                 + 2 * tb * 4)                                 # (TB,1) output x 2 buffers
    vmem_limit = min(max(vmem_need + (4 << 20), 32 << 20), 48 << 20)

    cost = pl.CostEstimate(
        flops=int(2 * B * (2 * D) * Hp + 2 * B * Hp),
        transcendentals=int(B),
        bytes_accessed=int(act_bytes * (2 * B * D + 2 * D * Hp)
                           + 4 * (2 * Hp + 1) + 4 * B),
    )

    s = pl.pallas_call(
        _ensemble_kernel,
        out_shape=jax.ShapeDtypeStruct((B, 1), jnp.float32),
        grid_spec=pltpu.PrefetchScalarGridSpec(
            num_scalar_prefetch=0,
            grid=grid,
            in_specs=[
                # Activations stream per batch tile.
                pl.BlockSpec((tb, D), lambda i: (i, 0)),
                pl.BlockSpec((tb, D), lambda i: (i, 0)),
                # Weights / biases resident in VMEM across the grid.
                pl.BlockSpec((D, Hp), lambda i: (0, 0)),
                pl.BlockSpec((D, Hp), lambda i: (0, 0)),
                pl.BlockSpec((1, Hp), lambda i: (0, 0)),
                pl.BlockSpec((Hp, 1), lambda i: (0, 0)),
                # Scalar logit-bias difference lives in SMEM.
                pl.BlockSpec(memory_space=pltpu.MemorySpace.SMEM),
            ],
            out_specs=pl.BlockSpec((tb, 1), lambda i: (i, 0)),
        ),
        compiler_params=pltpu.CompilerParams(
            dimension_semantics=("parallel",),     # shard batch tiles across v7x's 2 TCs
            vmem_limit_bytes=int(vmem_limit),
        ),
        cost_estimate=cost,
    )(ner, orig, w1a, w1b, b1p, w2d, b2d)

    # [1 - sigmoid(z), sigmoid(z)] == softmax([l0, l1]); formed outside the kernel.
    return jnp.concatenate([1.0 - s, s], axis=-1)


def init_params(key, input_dim):
    """Deterministic parameter init (matches nn.Linear shapes, synthetic values)."""
    k1, k2, k3, k4 = jax.random.split(key, 4)
    in1 = input_dim * 2
    hidden = 64
    out = 2
    lim1 = 1.0 / jnp.sqrt(jnp.float32(in1))
    lim2 = 1.0 / jnp.sqrt(jnp.float32(hidden))
    return {
        "w1": jax.random.uniform(k1, (in1, hidden), jnp.float32, -lim1, lim1),
        "b1": jax.random.uniform(k2, (1, hidden), jnp.float32, -lim1, lim1),
        "w2": jax.random.uniform(k3, (hidden, out), jnp.float32, -lim2, lim2),
        "b2": jax.random.uniform(k4, (1, out), jnp.float32, -lim2, lim2),
    }


def _reference(ner_emb, original_emb, params):
    combined = jnp.concatenate([ner_emb, original_emb], axis=-1)
    h = jnp.maximum(combined @ params["w1"] + params["b1"][0], 0.0)
    logits = h @ params["w2"] + params["b2"][0]
    return jax.nn.softmax(logits, axis=-1)


if __name__ == "__main__":
    key = jax.random.PRNGKey(0)
    k_params, k_ner, k_orig = jax.random.split(key, 3)

    batch = 8
    input_dim = 32  # small synthetic size (module default is 768)

    params = init_params(k_params, input_dim)
    ner_emb = jax.random.normal(k_ner, (batch, input_dim), jnp.float32)
    original_emb = jax.random.normal(k_orig, (batch, input_dim), jnp.float32)

    ref = _reference(ner_emb, original_emb, params)

    # Default (bf16-streamed) path: looser tolerance vs f32 reference.
    out = simple_ensemble_weights(ner_emb, original_emb, params)
    out = jax.block_until_ready(out)
    assert out.shape == (batch, 2)
    assert jnp.allclose(out, ref, atol=2e-2, rtol=2e-2), "bf16 path mismatch vs reference"
    assert jnp.allclose(jnp.sum(out, axis=-1), 1.0, atol=1e-5), "softmax not normalized"

    # f32-streamed path: tight tolerance.
    out32 = simple_ensemble_weights(ner_emb, original_emb, params,
                                    activation_dtype=jnp.float32)
    out32 = jax.block_until_ready(out32)
    assert jnp.allclose(out32, ref, atol=1e-5, rtol=1e-5), "f32 path mismatch vs reference"

    print("KERNEL_OK")
</pallas_src>

<mosaic_0001>
module attributes {stable_mosaic.version = 11 : i64} {
  func.func @_ensemble_kernel(%arg0: i32, %arg1: memref<8x32xbf16, #tpu.memory_space<vmem>>, %arg2: memref<8x32xbf16, #tpu.memory_space<vmem>>, %arg3: memref<32x128xbf16, #tpu.memory_space<vmem>>, %arg4: memref<32x128xbf16, #tpu.memory_space<vmem>>, %arg5: memref<1x128xf32, #tpu.memory_space<vmem>>, %arg6: memref<128x1xf32, #tpu.memory_space<vmem>>, %arg7: memref<1x1xf32, #tpu.memory_space<smem>>, %arg8: memref<8x1xf32, #tpu.memory_space<vmem>>) attributes {dimension_semantics = [#tpu.dimension_semantics<parallel>], iteration_bounds = array<i64: 1>, scalar_prefetch = 0 : i64, scratch_operands = 0 : i64, tpu.core_type = #tpu.core_type<tc>, window_params = [{transform_indices = @transform_0, window_bounds = array<i64: 8, 32>}, {transform_indices = @transform_1, window_bounds = array<i64: 8, 32>}, {pipeline_mode = #tpu.pipeline_mode<synchronous>, transform_indices = @transform_2, window_bounds = array<i64: 32, 128>}, {pipeline_mode = #tpu.pipeline_mode<synchronous>, transform_indices = @transform_3, window_bounds = array<i64: 32, 128>}, {pipeline_mode = #tpu.pipeline_mode<synchronous>, transform_indices = @transform_4, window_bounds = array<i64: 1, 128>}, {pipeline_mode = #tpu.pipeline_mode<synchronous>, transform_indices = @transform_5, window_bounds = array<i64: 128, 1>}, {transform_indices = @transform_6, window_bounds = array<i64: 1, 1>}, {transform_indices = @transform_7, window_bounds = array<i64: 8, 1>}]} {
    %c0 = arith.constant 0 : index
    %c0_0 = arith.constant 0 : index
    %0 = vector.load %arg1[%c0, %c0_0] : memref<8x32xbf16, #tpu.memory_space<vmem>>, vector<8x32xbf16>
    %c0_1 = arith.constant 0 : index
    %c0_2 = arith.constant 0 : index
    %1 = vector.load %arg3[%c0_1, %c0_2] : memref<32x128xbf16, #tpu.memory_space<vmem>>, vector<32x128xbf16>
    %cst = arith.constant dense<0.000000e+00> : vector<8x128xf32>
    %2 = tpu.matmul %0, %1, %cst {dimension_numbers = #tpu.dot_dimension_numbers<[1], [0], [0], [1], [0, 0, 1, 1], [], []>} : vector<8x32xbf16>, vector<32x128xbf16>, vector<8x128xf32> -> vector<8x128xf32>
    %c0_3 = arith.constant 0 : index
    %c0_4 = arith.constant 0 : index
    %3 = vector.load %arg2[%c0_3, %c0_4] : memref<8x32xbf16, #tpu.memory_space<vmem>>, vector<8x32xbf16>
    %c0_5 = arith.constant 0 : index
    %c0_6 = arith.constant 0 : index
    %4 = vector.load %arg4[%c0_5, %c0_6] : memref<32x128xbf16, #tpu.memory_space<vmem>>, vector<32x128xbf16>
    %cst_7 = arith.constant dense<0.000000e+00> : vector<8x128xf32>
    %5 = tpu.matmul %3, %4, %cst_7 {dimension_numbers = #tpu.dot_dimension_numbers<[1], [0], [0], [1], [0, 0, 1, 1], [], []>} : vector<8x32xbf16>, vector<32x128xbf16>, vector<8x128xf32> -> vector<8x128xf32>
    %6 = arith.addf %2, %5 : vector<8x128xf32>
    %c0_8 = arith.constant 0 : index
    %c0_9 = arith.constant 0 : index
    %7 = vector.load %arg5[%c0_8, %c0_9] : memref<1x128xf32, #tpu.memory_space<vmem>>, vector<1x128xf32>
    %8 = vector.broadcast %7 : vector<1x128xf32> to vector<8x128xf32>
    %9 = arith.addf %6, %8 : vector<8x128xf32>
    %cst_10 = arith.constant 0.000000e+00 : f32
    %10 = vector.broadcast %cst_10 : f32 to vector<8x128xf32>
    %11 = arith.maximumf %9, %10 : vector<8x128xf32>
    %c0_11 = arith.constant 0 : index
    %c0_12 = arith.constant 0 : index
    %12 = vector.load %arg6[%c0_11, %c0_12] : memref<128x1xf32, #tpu.memory_space<vmem>>, vector<128x1xf32>
    %cst_13 = arith.constant dense<0.000000e+00> : vector<8x1xf32>
    %13 = tpu.matmul %11, %12, %cst_13 {dimension_numbers = #tpu.dot_dimension_numbers<[1], [0], [0], [1], [0, 0, 1, 1], [], []>} : vector<8x128xf32>, vector<128x1xf32>, vector<8x1xf32> -> vector<8x1xf32>
    %c0_14 = arith.constant 0 : index
    %c0_15 = arith.constant 0 : index
    %14 = memref.load %arg7[%c0_14, %c0_15] : memref<1x1xf32, #tpu.memory_space<smem>>
    %15 = vector.broadcast %14 : f32 to vector<8x1xf32>
    %16 = arith.addf %13, %15 : vector<8x1xf32>
    %cst_16 = arith.constant 5.000000e-01 : f32
    %17 = vector.broadcast %cst_16 : f32 to vector<8x1xf32>
    %18 = arith.mulf %17, %16 : vector<8x1xf32>
    %19 = math.tanh %18 : vector<8x1xf32>
    %cst_17 = arith.constant 1.000000e+00 : f32
    %20 = vector.broadcast %cst_17 : f32 to vector<8x1xf32>
    %21 = arith.addf %19, %20 : vector<8x1xf32>
    %cst_18 = arith.constant 5.000000e-01 : f32
    %22 = vector.broadcast %cst_18 : f32 to vector<8x1xf32>
    %23 = arith.mulf %22, %21 : vector<8x1xf32>
    %c0_19 = arith.constant 0 : index
    %c0_20 = arith.constant 0 : index
    %24 = vector.load %arg8[%c0_19, %c0_20] : memref<8x1xf32, #tpu.memory_space<vmem>>, vector<8x1xf32>
    tpu.vector_store %arg8[%c0_19, %c0_20], %23 {strides = array<i32>} : memref<8x1xf32, #tpu.memory_space<vmem>>, vector<8x1xf32>,
    return
  }
  func.func @transform_0(%arg0: i32) -> (i32, i32) {
    %c0_i32 = arith.constant 0 : i32
    %c0_i32_0 = arith.constant 0 : i32
    return %arg0, %c0_i32 : i32, i32
  }
  func.func @transform_1(%arg0: i32) -> (i32, i32) {
    %c0_i32 = arith.constant 0 : i32
    %c0_i32_0 = arith.constant 0 : i32
    return %arg0, %c0_i32 : i32, i32
  }
  func.func @transform_2(%arg0: i32) -> (i32, i32) {
    %c0_i32 = arith.constant 0 : i32
    %c0_i32_0 = arith.constant 0 : i32
    %c0_i32_1 = arith.constant 0 : i32
    return %c0_i32, %c0_i32_0 : i32, i32
  }
  func.func @transform_3(%arg0: i32) -> (i32, i32) {
    %c0_i32 = arith.constant 0 : i32
    %c0_i32_0 = arith.constant 0 : i32
    %c0_i32_1 = arith.constant 0 : i32
    return %c0_i32, %c0_i32_0 : i32, i32
  }
  func.func @transform_4(%arg0: i32) -> (i32, i32) {
    %c0_i32 = arith.constant 0 : i32
    %c0_i32_0 = arith.constant 0 : i32
    %c0_i32_1 = arith.constant 0 : i32
    return %c0_i32, %c0_i32_0 : i32, i32
  }
  func.func @transform_5(%arg0: i32) -> (i32, i32) {
    %c0_i32 = arith.constant 0 : i32
    %c0_i32_0 = arith.constant 0 : i32
    %c0_i32_1 = arith.constant 0 : i32
    return %c0_i32, %c0_i32_0 : i32, i32
  }
  func.func @transform_6(%arg0: i32) -> (i32, i32) {
    %c0_i32 = arith.constant 0 : i32
    %c0_i32_0 = arith.constant 0 : i32
    %c0_i32_1 = arith.constant 0 : i32
    return %c0_i32, %c0_i32_0 : i32, i32
  }
  func.func @transform_7(%arg0: i32) -> (i32, i32) {
    %c0_i32 = arith.constant 0 : i32
    %c0_i32_0 = arith.constant 0 : i32
    return %arg0, %c0_i32 : i32, i32
  }
}

</mosaic_0001>

<bundles_post_ra>
// kernel: tpu_custom_call.1
= control target key start
LH: loop header
LB: loop body
LE: loop exit
PB: predicated region body
PF: predicated region fallthrough
CT: control target
= control target key end

     0   :  { %v370_v0 = vmov 0.0   ;;  %vm371_vm0 = vmmov 0   ;;  %v372_v2 = vmov 0.0|0.0   ;;  %vm50_vm1 = vcmask 261120   ;;  %s493_s3 = inlined_call_operand.vmem [shape: bf16[32,128], index: 3, kind: input, shape index: {}]   ;;  %s494_s2 = inlined_call_operand.vmem [shape: bf16[32,128], index: 2, kind: input, shape index: {}]   ;;  %s495_s5 = inlined_call_operand.vmem [shape: f32[128,1], index: 5, kind: input, shape index: {}]   ;;  %s496_s1 = inlined_call_operand.vmem [shape: bf16[8,32], index: 1, kind: input, shape index: {}]   ;;  %s497_s0 = inlined_call_operand.vmem [shape: bf16[8,32], index: 0, kind: input, shape index: {}]   ;;  %s498_s4 = inlined_call_operand.vmem [shape: f32[1,128], index: 4, kind: input, shape index: {}]   ;;  %s499_s6 = inlined_call_operand.<no memory space> [shape: f32[1,1], index: 6, kind: input, shape index: {}]   ;;  %s500_s7 = inlined_call_operand.vmem [shape: f32[8,1], index: 7, kind: output, shape index: {}]  }
   0x1   :  { %286 = vmatprep.subr.bf16.mxu1 %v370_v0  ;;  %v364_v1 = vld [vmem:[%s493_s3] sm:$0xff]   ;;  %290 = vmatprep.mubr.msk.bf16.mxu1 %vm371_vm0, %v370_v0  ;;  %v365_v3 = vld [vmem:[%s493_s3 + $0x8] sm:$0xff]   ;;  %v160_v6 = vld [vmem:[%s495_s5 + $0x10] sm:$0xff]  ;;  %v175_v44 = vstv %s499_s6  ;;  %vm250_vm2 = vcmask 7168  }
   0x2   :  { %337 = vmatprep.subr.bf16.mxu0 %v372_v2  ;;  %334 = vmatprep.mubr.msk.f32.mxu0 %vm371_vm0, %v370_v0  ;;  %v158_v4 = vld [vmem:[%s495_s5] sm:$0xff]  ;;  %v159_v5 = vld [vmem:[%s495_s5 + $0x8] sm:$0xff]  ;;  %v161_v7 = vld [vmem:[%s495_s5 + $0x18] sm:$0xff] }
   0x3   :  { %287 = vmatpush3.bf16.msra.mxu1 %v364_v1  ;;  %v33_v8 = vld [vmem:[%s496_s1] sm:$0xf]  ;;  %v338_v10 = vpack.c.bf16 %v159_v5, %v158_v4  ;;  %v341_v11 = vpack.c.bf16 %v161_v7, %v160_v6  ;;  %v163_v13 = vld [vmem:[%s495_s5 + $0x28] sm:$0xff]  ;;  %v164_v16 = vld [vmem:[%s495_s5 + $0x30] sm:$0xff] }
   0x4   :  { %288 = vmatprep.subr.bf16.mxu1 %v370_v0  ;;  %v366_v9 = vld [vmem:[%s494_s2] sm:$0xff]   ;;  %v367_v14 = vld [vmem:[%s494_s2 + $0x8] sm:$0xff]   ;;  %v165_v17 = vld [vmem:[%s495_s5 + $0x38] sm:$0xff] }
   0x5   :  { %339 = vmatpush3.bf16.msra.mxu0 %v338_v10  ;;  %v162_v12 = vld [vmem:[%s495_s5 + $0x20] sm:$0xff]  ;;  %v347_v19 = vpack.c.bf16 %v165_v17, %v164_v16  ;;  %v167_v21 = vld [vmem:[%s495_s5 + $0x48] sm:$0xff]  ;;  %v168_v23 = vld [vmem:[%s495_s5 + $0x50] sm:$0xff] }
   0x6   :  { %340 = vmatprep.subr.bf16.mxu0 %v372_v2  ;;  %v344_v15 = vpack.c.bf16 %v163_v13, %v162_v12  ;;  %v28_v18 = vld [vmem:[%s497_s0] sm:$0xf]  ;;  %v169_v24 = vld [vmem:[%s495_s5 + $0x58] sm:$0xff]  ;;  %v171_v27 = vld [vmem:[%s495_s5 + $0x68] sm:$0xff] }
   0x7   :  { %289 = vmatpush3.bf16.msra.mxu1 %v365_v3  ;;  %v166_v20 = vld [vmem:[%s495_s5 + $0x40] sm:$0xff]  ;;  %v353_v25 = vpack.c.bf16 %v169_v24, %v168_v23  ;;  %v172_v29 = vld [vmem:[%s495_s5 + $0x70] sm:$0xff]  ;;  %v173_v30 = vld [vmem:[%s495_s5 + $0x78] sm:$0xff] }
   0x8   :  { %294 = vmatprep.subr.bf16.mxu1 %v370_v0  ;;  %v350_v22 = vpack.c.bf16 %v167_v21, %v166_v20  ;;  %v170_v26 = vld [vmem:[%s495_s5 + $0x60] sm:$0xff]  ;;  %v359_v31 = vpack.c.bf16 %v173_v30, %v172_v29 }
   0x9   :  { %342 = vmatpush3.bf16.msra.mxu0 %v341_v11  ;;  %v356_v28 = vpack.c.bf16 %v171_v27, %v170_v26  ;;  %v262_v37 = vld [vmem:[%s498_s4] ss:$0 sm:$0xff] }
   0xa   :  { %291 = vmatmul.mubr.msk.bf16.vlgmr.msra.gmra.mrb[0].mxu1 %vm50_vm1, %v33_v8  ;;  %343 = vmatprep.subr.bf16.mxu0 %v372_v2 }
   0xb   :  { %295 = vmatpush3.bf16.msra.mxu1 %v366_v9  ;;  %298 = vmatprep.mubr.msk.bf16.mxu1 %vm371_vm0, %v370_v0 }
   0xc   :  { %296 = vmatprep.subr.bf16.mxu1 %v370_v0 }
   0xd   :  { %345 = vmatpush3.bf16.msra.mxu0 %v344_v15 }
   0xe   :  { %346 = vmatprep.subr.bf16.mxu0 %v372_v2 }
   0xf   :  { %297 = vmatpush3.bf16.msra.mxu1 %v367_v14 }
  0x11   :  { %348 = vmatpush3.bf16.msra.mxu0 %v347_v19 }
  0x12   :  { %299 = vmatmul.mubr.msk.bf16.vlgmr.msra.gmra.mrb[4].mxu1 %vm50_vm1, %v28_v18  ;;  %349 = vmatprep.subr.bf16.mxu0 %v372_v2 }
  0x15   :  { %351 = vmatpush3.bf16.msra.mxu0 %v350_v22 }
  0x16   :  { %352 = vmatprep.subr.bf16.mxu0 %v372_v2 }
  0x19   :  { %354 = vmatpush3.bf16.msra.mxu0 %v353_v25 }
  0x1a   :  { %355 = vmatprep.subr.bf16.mxu0 %v372_v2 }
  0x1d   :  { %357 = vmatpush3.bf16.msra.mxu0 %v356_v28 }
  0x1e   :  { %358 = vmatprep.subr.bf16.mxu0 %v372_v2 }
  0x21   :  { %360 = vmatpush3.bf16.msra.mxu0 %v359_v31 }
  0xdd   :  { %v88_v32 = vpop.f32.mrb[0].mxu1 }
  0xde   :  { %v292_v33 = vpop.f32.mrb[1].mxu1 }
  0xdf   :  { %v91_v34 = vpop.f32.mrb[2].mxu1 }
  0xe0   :  { %v293_v35 = vpop.f32.mrb[3].mxu1 }
  0xe5   :  { %v143_v36 = vpop.f32.mrb[4].mxu1 }
  0xe6   :  { %v144_v38 = vadd.f32 %v143_v36, %v88_v32  ;;  %v300_v39 = vpop.f32.mrb[5].mxu1 }
  0xe7   :  { %v146_v40 = vpop.f32.mrb[6].mxu1 }
  0xe8   :  { %v156_v41 = vadd.f32 %v262_v37, %v144_v38  ;;  %v301_v42 = vpop.f32.mrb[7].mxu1 }
  0xea   :  { %v157_v43 = vmax.f32 %v156_v41, 0.0 }
  0xec   :  { %335 = vmatmul.mubr.f32.vlgmr.msra.gmra.mrb[0].mxu0 %v157_v43 }
 0x1bf   :  { %v242_v45 = vpop.f32.mrb[0].mxu0 }
 0x1c0   :  { %v243_v46 = vadd.f32 %v242_v45, %v175_v44  ;;  %v336_v47 = vpop.f32.mrb[1].mxu0 }
 0x1c2   :  { %v246_v48 = vmul.f32 0.5, %v243_v46 }
 0x1c4   :  { %368 = vtanh.f32 %v246_v48 }
 0x1ce   :  { %v369_v49 = vpop.eup %368 }
 0x1cf   :  { %v248_v50 = vadd.f32 1.0, %v369_v49 }
 0x1d1   :  { %v249_v51 = vmul.f32 0.5, %v248_v50 }
 0x1d3   :  { %251 = vst.msk [vmem:[%s500_s7] sm:$0xff] %vm250_vm2, %v249_v51 }

</bundles_post_ra>
